<compile_context>
chip_gen: v7x
topology: tpu7x:2x2x1
jax: 0.10.0
libtpu: 0.0.40
codegen_flags: <defaults>
</compile_context>

<pallas_src>
import math
from functools import partial

import jax
import jax.numpy as jnp
from jax.experimental import pallas as pl
from jax.experimental.pallas import tpu as pltpu

IN_FEAT = 13
HIDDEN = 30
PACKED = 2 * HIDDEN          # 60 = [layer-0 | layer-1] packed state width
MLP_HIDDEN = 128


def dbht_kernel(x_ref,
                wih0p_ref, wpack_ref, bpack_ref,
                w1p_ref, b1_ref, w2_ref, b2_ref, w3row_ref, b3_ref,
                o_ref,
                proj_ref, hpack_ref,
                *, seq_len, batch):
    """Whole forward in one kernel invocation.

    x_ref     : (S*B, 13)  time-major flattened input
    wih0p_ref : (13, 60)   [Wih0^T | 0]
    wpack_ref : (60, 60)   [[Whh0^T, Wih1^T], [0, Whh1^T]]
    bpack_ref : (1, 60)    [b_ih0+b_hh0 | b_ih1+b_hh1]
    w1p_ref   : (60, 128)  [[0], [W1^T]]
    o_ref     : (S*B, 1)
    proj_ref  : (S*B, 60) scratch -- packed input projections, written once
                before the loop, only read inside it.
    hpack_ref : (S*B, 60) scratch -- packed states, write-only inside the
                loop, read once by the batched MLP head.
    """
    S, B, H = seq_len, batch, HIDDEN

    # ---- batched packed input projection for ALL timesteps (one MXU op) ----
    # proj[t*B:(t+1)*B] = [ x_t@Wih0^T + (b_ih0+b_hh0) | (b_ih1+b_hh1) ]
    proj_ref[...] = (jnp.dot(x_ref[...], wih0p_ref[...],
                             preferred_element_type=jnp.float32)
                     + bpack_ref[...])

    wpack = wpack_ref[...]

    # ---- wavefront recurrence: packed state s_t = [h0_t | h1_{t-1}] --------
    # Carry lives in registers; one matmul + one tanh per step on the serial
    # chain.  Step 0: h_{-1}=0 so skip the matmul; the layer-1 half must be
    # zeroed (it represents h1_{-1}=0 for step 1).
    lane = jax.lax.broadcasted_iota(jnp.int32, (B, PACKED), 1)
    s = jnp.where(lane < H, jnp.tanh(proj_ref[0:B, :]), 0.0)

    for t in range(1, S):                     # S is small -> static unroll
        rec = jnp.dot(s, wpack, preferred_element_type=jnp.float32)
        s = jnp.tanh(rec + proj_ref[t * B:(t + 1) * B, :])
        # write-only store (h1_{t-1} in the right half); never read until the
        # MLP below, so it does not serialize against the carry chain.
        hpack_ref[(t - 1) * B:t * B, :] = s

    # Final wavefront step: only layer 1 advances (produces h1_{S-1} in the
    # right half).  The left half is junk but is discarded by w1p's zero block.
    rec = jnp.dot(s, wpack, preferred_element_type=jnp.float32)
    hpack_ref[(S - 1) * B:S * B, :] = jnp.tanh(rec + bpack_ref[...])

    # ---- MLP head, batched over all S*B rows (3 ops instead of 3*S) --------
    # hpack @ [[0],[W1^T]] == h1 @ W1^T  (no lane slicing needed).
    z = jnp.maximum(
        jnp.dot(hpack_ref[...], w1p_ref[...],
                preferred_element_type=jnp.float32) + b1_ref[...], 0.0)
    z = jnp.maximum(
        jnp.dot(z, w2_ref[...], preferred_element_type=jnp.float32)
        + b2_ref[...], 0.0)
    # final (., 128)@(128, 1): N=1 wastes an MXU pass -> VPU mul + lane reduce
    z = jnp.maximum(
        jnp.sum(z * w3row_ref[...], axis=-1, keepdims=True) + b3_ref[...], 0.0)

    # single dense store (lane-width 1 is negligible at this row count)
    o_ref[...] = z.astype(o_ref.dtype)


def init_params(key):
    """Deterministic init mirroring the PyTorch parameter shapes/ranges."""
    ks = iter(jax.random.split(key, 16))

    def u(k, shape, fan):
        bound = 1.0 / math.sqrt(fan)
        return jax.random.uniform(k, shape, jnp.float32, -bound, bound)

    return {
        # nn.RNN(13, 30, 2)
        "w_ih_l0": u(next(ks), (HIDDEN, IN_FEAT), HIDDEN),
        "w_hh_l0": u(next(ks), (HIDDEN, HIDDEN), HIDDEN),
        "b_ih_l0": u(next(ks), (HIDDEN,), HIDDEN),
        "b_hh_l0": u(next(ks), (HIDDEN,), HIDDEN),
        "w_ih_l1": u(next(ks), (HIDDEN, HIDDEN), HIDDEN),
        "w_hh_l1": u(next(ks), (HIDDEN, HIDDEN), HIDDEN),
        "b_ih_l1": u(next(ks), (HIDDEN,), HIDDEN),
        "b_hh_l1": u(next(ks), (HIDDEN,), HIDDEN),
        # linear1/2/3
        "w1": u(next(ks), (MLP_HIDDEN, HIDDEN), HIDDEN),
        "b1": u(next(ks), (MLP_HIDDEN,), HIDDEN),
        "w2": u(next(ks), (MLP_HIDDEN, MLP_HIDDEN), MLP_HIDDEN),
        "b2": u(next(ks), (MLP_HIDDEN,), MLP_HIDDEN),
        "w3": u(next(ks), (1, MLP_HIDDEN), MLP_HIDDEN),
        "b3": u(next(ks), (1,), MLP_HIDDEN),
    }


def prepare_params(p):
    """One-time packing/transposes so the per-call wrapper does no extra work.

    Builds the wavefront-packed weights:
      wih0p = [Wih0^T | 0]                 (13, 60)
      wpack = [[Whh0^T, Wih1^T],
               [0,      Whh1^T]]           (60, 60)
      bpack = [b_ih0+b_hh0 | b_ih1+b_hh1]  (1, 60)
      w1p   = [[0], [W1^T]]                (60, 128)
    """
    zH = jnp.zeros((HIDDEN, HIDDEN), jnp.float32)
    wih0p = jnp.concatenate(
        [p["w_ih_l0"].T, jnp.zeros((IN_FEAT, HIDDEN), jnp.float32)], axis=1)
    wpack = jnp.block([[p["w_hh_l0"].T, p["w_ih_l1"].T],
                       [zH,             p["w_hh_l1"].T]])
    bpack = jnp.concatenate(
        [p["b_ih_l0"] + p["b_hh_l0"],
         p["b_ih_l1"] + p["b_hh_l1"]]).reshape(1, PACKED)
    w1p = jnp.concatenate(
        [jnp.zeros((HIDDEN, MLP_HIDDEN), jnp.float32), p["w1"].T], axis=0)
    return (
        wih0p, wpack, bpack,
        w1p, p["b1"].reshape(1, MLP_HIDDEN),
        p["w2"].T, p["b2"].reshape(1, MLP_HIDDEN),
        p["w3"].reshape(1, MLP_HIDDEN),       # row form for the VPU reduce
        p["b3"].reshape(1, 1),
    )


@jax.jit
def dbht_forward(x, prepped):
    S, B, F = x.shape
    x_flat = x.reshape(S * B, F)              # time-major flatten
    vmem = pl.BlockSpec(memory_space=pltpu.MemorySpace.VMEM)
    out = pl.pallas_call(
        partial(dbht_kernel, seq_len=S, batch=B),
        out_shape=jax.ShapeDtypeStruct((S * B, 1), jnp.float32),
        in_specs=[vmem] * (1 + len(prepped)),
        out_specs=vmem,
        scratch_shapes=[pltpu.VMEM((S * B, PACKED), jnp.float32),   # proj_ref
                        pltpu.VMEM((S * B, PACKED), jnp.float32)],  # hpack_ref
    )(x_flat, *prepped)
    return out.reshape(S, B, 1)


def dbht_forward_ref(x, p):
    """Pure-JAX reference (mirrors torch semantics exactly)."""
    S, B, _ = x.shape
    h0 = jnp.zeros((B, HIDDEN), jnp.float32)
    h1 = jnp.zeros((B, HIDDEN), jnp.float32)
    outs = []
    for t in range(S):
        xt = x[t]
        h0 = jnp.tanh(xt @ p["w_ih_l0"].T + p["b_ih_l0"]
                      + h0 @ p["w_hh_l0"].T + p["b_hh_l0"])
        h1 = jnp.tanh(h0 @ p["w_ih_l1"].T + p["b_ih_l1"]
                      + h1 @ p["w_hh_l1"].T + p["b_hh_l1"])
        z = jnp.maximum(h1 @ p["w1"].T + p["b1"], 0.0)
        z = jnp.maximum(z @ p["w2"].T + p["b2"], 0.0)
        z = jnp.maximum(z @ p["w3"].T + p["b3"], 0.0)
        outs.append(z)
    return jnp.stack(outs, axis=0)


if __name__ == "__main__":
    key = jax.random.PRNGKey(0)
    k_x, k_p = jax.random.split(key)

    SEQ, BATCH = 8, 2
    x = jax.random.normal(k_x, (SEQ, BATCH, IN_FEAT), jnp.float32)
    params = init_params(k_p)
    prepped = prepare_params(params)          # done once, outside the forward

    out = dbht_forward(x, prepped)
    jax.block_until_ready(out)

    ref = dbht_forward_ref(x, params)
    assert out.shape == (SEQ, BATCH, 1)
    assert jnp.allclose(out, ref, atol=1e-5, rtol=1e-5), "mismatch vs reference"

    print("KERNEL_OK")
</pallas_src>

<mosaic_0001>
module attributes {stable_mosaic.version = 11 : i64} {
  func.func @dbht_kernel(%arg0: memref<16x13xf32, #tpu.memory_space<vmem>>, %arg1: memref<13x60xf32, #tpu.memory_space<vmem>>, %arg2: memref<60x60xf32, #tpu.memory_space<vmem>>, %arg3: memref<1x60xf32, #tpu.memory_space<vmem>>, %arg4: memref<60x128xf32, #tpu.memory_space<vmem>>, %arg5: memref<1x128xf32, #tpu.memory_space<vmem>>, %arg6: memref<128x128xf32, #tpu.memory_space<vmem>>, %arg7: memref<1x128xf32, #tpu.memory_space<vmem>>, %arg8: memref<1x128xf32, #tpu.memory_space<vmem>>, %arg9: memref<1x1xf32, #tpu.memory_space<vmem>>, %arg10: memref<16x1xf32, #tpu.memory_space<vmem>>, %arg11: memref<16x60xf32, #tpu.memory_space<vmem>>, %arg12: memref<16x60xf32, #tpu.memory_space<vmem>>) attributes {dimension_semantics = [], scalar_prefetch = 0 : i64, scratch_operands = 2 : i64, tpu.core_type = #tpu.core_type<tc>} {
    %c0 = arith.constant 0 : index
    %c0_0 = arith.constant 0 : index
    %0 = vector.load %arg0[%c0, %c0_0] : memref<16x13xf32, #tpu.memory_space<vmem>>, vector<16x13xf32>
    %c0_1 = arith.constant 0 : index
    %c0_2 = arith.constant 0 : index
    %1 = vector.load %arg1[%c0_1, %c0_2] : memref<13x60xf32, #tpu.memory_space<vmem>>, vector<13x60xf32>
    %cst = arith.constant dense<0.000000e+00> : vector<16x60xf32>
    %2 = tpu.matmul %0, %1, %cst {dimension_numbers = #tpu.dot_dimension_numbers<[1], [0], [0], [1], [0, 0, 1, 1], [], []>} : vector<16x13xf32>, vector<13x60xf32>, vector<16x60xf32> -> vector<16x60xf32>
    %c0_3 = arith.constant 0 : index
    %c0_4 = arith.constant 0 : index
    %3 = vector.load %arg3[%c0_3, %c0_4] : memref<1x60xf32, #tpu.memory_space<vmem>>, vector<1x60xf32>
    %4 = vector.broadcast %3 : vector<1x60xf32> to vector<16x60xf32>
    %5 = arith.addf %2, %4 : vector<16x60xf32>
    %c0_5 = arith.constant 0 : index
    %c0_6 = arith.constant 0 : index
    %6 = vector.load %arg11[%c0_5, %c0_6] : memref<16x60xf32, #tpu.memory_space<vmem>>, vector<16x60xf32>
    tpu.vector_store %arg11[%c0_5, %c0_6], %5 {strides = array<i32>} : memref<16x60xf32, #tpu.memory_space<vmem>>, vector<16x60xf32>,
    %c0_7 = arith.constant 0 : index
    %c0_8 = arith.constant 0 : index
    %7 = vector.load %arg2[%c0_7, %c0_8] : memref<60x60xf32, #tpu.memory_space<vmem>>, vector<60x60xf32>
    %8 = tpu.iota {dimensions = array<i32: 1>} : vector<2x60xi32>
    %c30_i32 = arith.constant 30 : i32
    %9 = vector.broadcast %c30_i32 : i32 to vector<2x60xi32>
    %10 = arith.cmpi slt, %8, %9 : vector<2x60xi32>
    %c0_9 = arith.constant 0 : index
    %c0_10 = arith.constant 0 : index
    %11 = vector.load %arg11[%c0_9, %c0_10] : memref<16x60xf32, #tpu.memory_space<vmem>>, vector<2x60xf32>
    %12 = math.tanh %11 : vector<2x60xf32>
    %cst_11 = arith.constant 0.000000e+00 : f32
    %13 = vector.broadcast %cst_11 : f32 to vector<2x60xf32>
    %14 = arith.select %10, %12, %13 : vector<2x60xi1>, vector<2x60xf32>
    %cst_12 = arith.constant dense<0.000000e+00> : vector<2x60xf32>
    %15 = tpu.matmul %14, %7, %cst_12 {dimension_numbers = #tpu.dot_dimension_numbers<[1], [0], [0], [1], [0, 0, 1, 1], [], []>} : vector<2x60xf32>, vector<60x60xf32>, vector<2x60xf32> -> vector<2x60xf32>
    %c2 = arith.constant 2 : index
    %c0_13 = arith.constant 0 : index
    %16 = vector.load %arg11[%c2, %c0_13] : memref<16x60xf32, #tpu.memory_space<vmem>>, vector<2x60xf32>
    %17 = arith.addf %15, %16 : vector<2x60xf32>
    %18 = math.tanh %17 : vector<2x60xf32>
    %c0_14 = arith.constant 0 : index
    %c0_15 = arith.constant 0 : index
    %19 = vector.load %arg12[%c0_14, %c0_15] : memref<16x60xf32, #tpu.memory_space<vmem>>, vector<2x60xf32>
    tpu.vector_store %arg12[%c0_14, %c0_15], %18 {strides = array<i32>} : memref<16x60xf32, #tpu.memory_space<vmem>>, vector<2x60xf32>,
    %cst_16 = arith.constant dense<0.000000e+00> : vector<2x60xf32>
    %20 = tpu.matmul %18, %7, %cst_16 {dimension_numbers = #tpu.dot_dimension_numbers<[1], [0], [0], [1], [0, 0, 1, 1], [], []>} : vector<2x60xf32>, vector<60x60xf32>, vector<2x60xf32> -> vector<2x60xf32>
    %c4 = arith.constant 4 : index
    %c0_17 = arith.constant 0 : index
    %21 = vector.load %arg11[%c4, %c0_17] : memref<16x60xf32, #tpu.memory_space<vmem>>, vector<2x60xf32>
    %22 = arith.addf %20, %21 : vector<2x60xf32>
    %23 = math.tanh %22 : vector<2x60xf32>
    %c2_18 = arith.constant 2 : index
    %c0_19 = arith.constant 0 : index
    %24 = vector.load %arg12[%c2_18, %c0_19] : memref<16x60xf32, #tpu.memory_space<vmem>>, vector<2x60xf32>
    tpu.vector_store %arg12[%c2_18, %c0_19], %23 {strides = array<i32>} : memref<16x60xf32, #tpu.memory_space<vmem>>, vector<2x60xf32>,
    %cst_20 = arith.constant dense<0.000000e+00> : vector<2x60xf32>
    %25 = tpu.matmul %23, %7, %cst_20 {dimension_numbers = #tpu.dot_dimension_numbers<[1], [0], [0], [1], [0, 0, 1, 1], [], []>} : vector<2x60xf32>, vector<60x60xf32>, vector<2x60xf32> -> vector<2x60xf32>
    %c6 = arith.constant 6 : index
    %c0_21 = arith.constant 0 : index
    %26 = vector.load %arg11[%c6, %c0_21] : memref<16x60xf32, #tpu.memory_space<vmem>>, vector<2x60xf32>
    %27 = arith.addf %25, %26 : vector<2x60xf32>
    %28 = math.tanh %27 : vector<2x60xf32>
    %c4_22 = arith.constant 4 : index
    %c0_23 = arith.constant 0 : index
    %29 = vector.load %arg12[%c4_22, %c0_23] : memref<16x60xf32, #tpu.memory_space<vmem>>, vector<2x60xf32>
    tpu.vector_store %arg12[%c4_22, %c0_23], %28 {strides = array<i32>} : memref<16x60xf32, #tpu.memory_space<vmem>>, vector<2x60xf32>,
    %cst_24 = arith.constant dense<0.000000e+00> : vector<2x60xf32>
    %30 = tpu.matmul %28, %7, %cst_24 {dimension_numbers = #tpu.dot_dimension_numbers<[1], [0], [0], [1], [0, 0, 1, 1], [], []>} : vector<2x60xf32>, vector<60x60xf32>, vector<2x60xf32> -> vector<2x60xf32>
    %c8 = arith.constant 8 : index
    %c0_25 = arith.constant 0 : index
    %31 = vector.load %arg11[%c8, %c0_25] : memref<16x60xf32, #tpu.memory_space<vmem>>, vector<2x60xf32>
    %32 = arith.addf %30, %31 : vector<2x60xf32>
    %33 = math.tanh %32 : vector<2x60xf32>
    %c6_26 = arith.constant 6 : index
    %c0_27 = arith.constant 0 : index
    %34 = vector.load %arg12[%c6_26, %c0_27] : memref<16x60xf32, #tpu.memory_space<vmem>>, vector<2x60xf32>
    tpu.vector_store %arg12[%c6_26, %c0_27], %33 {strides = array<i32>} : memref<16x60xf32, #tpu.memory_space<vmem>>, vector<2x60xf32>,
    %cst_28 = arith.constant dense<0.000000e+00> : vector<2x60xf32>
    %35 = tpu.matmul %33, %7, %cst_28 {dimension_numbers = #tpu.dot_dimension_numbers<[1], [0], [0], [1], [0, 0, 1, 1], [], []>} : vector<2x60xf32>, vector<60x60xf32>, vector<2x60xf32> -> vector<2x60xf32>
    %c10 = arith.constant 10 : index
    %c0_29 = arith.constant 0 : index
    %36 = vector.load %arg11[%c10, %c0_29] : memref<16x60xf32, #tpu.memory_space<vmem>>, vector<2x60xf32>
    %37 = arith.addf %35, %36 : vector<2x60xf32>
    %38 = math.tanh %37 : vector<2x60xf32>
    %c8_30 = arith.constant 8 : index
    %c0_31 = arith.constant 0 : index
    %39 = vector.load %arg12[%c8_30, %c0_31] : memref<16x60xf32, #tpu.memory_space<vmem>>, vector<2x60xf32>
    tpu.vector_store %arg12[%c8_30, %c0_31], %38 {strides = array<i32>} : memref<16x60xf32, #tpu.memory_space<vmem>>, vector<2x60xf32>,
    %cst_32 = arith.constant dense<0.000000e+00> : vector<2x60xf32>
    %40 = tpu.matmul %38, %7, %cst_32 {dimension_numbers = #tpu.dot_dimension_numbers<[1], [0], [0], [1], [0, 0, 1, 1], [], []>} : vector<2x60xf32>, vector<60x60xf32>, vector<2x60xf32> -> vector<2x60xf32>
    %c12 = arith.constant 12 : index
    %c0_33 = arith.constant 0 : index
    %41 = vector.load %arg11[%c12, %c0_33] : memref<16x60xf32, #tpu.memory_space<vmem>>, vector<2x60xf32>
    %42 = arith.addf %40, %41 : vector<2x60xf32>
    %43 = math.tanh %42 : vector<2x60xf32>
    %c10_34 = arith.constant 10 : index
    %c0_35 = arith.constant 0 : index
    %44 = vector.load %arg12[%c10_34, %c0_35] : memref<16x60xf32, #tpu.memory_space<vmem>>, vector<2x60xf32>
    tpu.vector_store %arg12[%c10_34, %c0_35], %43 {strides = array<i32>} : memref<16x60xf32, #tpu.memory_space<vmem>>, vector<2x60xf32>,
    %cst_36 = arith.constant dense<0.000000e+00> : vector<2x60xf32>
    %45 = tpu.matmul %43, %7, %cst_36 {dimension_numbers = #tpu.dot_dimension_numbers<[1], [0], [0], [1], [0, 0, 1, 1], [], []>} : vector<2x60xf32>, vector<60x60xf32>, vector<2x60xf32> -> vector<2x60xf32>
    %c14 = arith.constant 14 : index
    %c0_37 = arith.constant 0 : index
    %46 = vector.load %arg11[%c14, %c0_37] : memref<16x60xf32, #tpu.memory_space<vmem>>, vector<2x60xf32>
    %47 = arith.addf %45, %46 : vector<2x60xf32>
    %48 = math.tanh %47 : vector<2x60xf32>
    %c12_38 = arith.constant 12 : index
    %c0_39 = arith.constant 0 : index
    %49 = vector.load %arg12[%c12_38, %c0_39] : memref<16x60xf32, #tpu.memory_space<vmem>>, vector<2x60xf32>
    tpu.vector_store %arg12[%c12_38, %c0_39], %48 {strides = array<i32>} : memref<16x60xf32, #tpu.memory_space<vmem>>, vector<2x60xf32>,
    %cst_40 = arith.constant dense<0.000000e+00> : vector<2x60xf32>
    %50 = tpu.matmul %48, %7, %cst_40 {dimension_numbers = #tpu.dot_dimension_numbers<[1], [0], [0], [1], [0, 0, 1, 1], [], []>} : vector<2x60xf32>, vector<60x60xf32>, vector<2x60xf32> -> vector<2x60xf32>
    %c0_41 = arith.constant 0 : index
    %c0_42 = arith.constant 0 : index
    %51 = vector.load %arg3[%c0_41, %c0_42] : memref<1x60xf32, #tpu.memory_space<vmem>>, vector<1x60xf32>
    %52 = vector.broadcast %51 : vector<1x60xf32> to vector<2x60xf32>
    %53 = arith.addf %50, %52 : vector<2x60xf32>
    %54 = math.tanh %53 : vector<2x60xf32>
    %c14_43 = arith.constant 14 : index
    %c0_44 = arith.constant 0 : index
    %55 = vector.load %arg12[%c14_43, %c0_44] : memref<16x60xf32, #tpu.memory_space<vmem>>, vector<2x60xf32>
    tpu.vector_store %arg12[%c14_43, %c0_44], %54 {strides = array<i32>} : memref<16x60xf32, #tpu.memory_space<vmem>>, vector<2x60xf32>,
    %c0_45 = arith.constant 0 : index
    %c0_46 = arith.constant 0 : index
    %56 = vector.load %arg12[%c0_45, %c0_46] : memref<16x60xf32, #tpu.memory_space<vmem>>, vector<16x60xf32>
    %c0_47 = arith.constant 0 : index
    %c0_48 = arith.constant 0 : index
    %57 = vector.load %arg4[%c0_47, %c0_48] : memref<60x128xf32, #tpu.memory_space<vmem>>, vector<60x128xf32>
    %cst_49 = arith.constant dense<0.000000e+00> : vector<16x128xf32>
    %58 = tpu.matmul %56, %57, %cst_49 {dimension_numbers = #tpu.dot_dimension_numbers<[1], [0], [0], [1], [0, 0, 1, 1], [], []>} : vector<16x60xf32>, vector<60x128xf32>, vector<16x128xf32> -> vector<16x128xf32>
    %c0_50 = arith.constant 0 : index
    %c0_51 = arith.constant 0 : index
    %59 = vector.load %arg5[%c0_50, %c0_51] : memref<1x128xf32, #tpu.memory_space<vmem>>, vector<1x128xf32>
    %60 = vector.broadcast %59 : vector<1x128xf32> to vector<16x128xf32>
    %61 = arith.addf %58, %60 : vector<16x128xf32>
    %cst_52 = arith.constant 0.000000e+00 : f32
    %62 = vector.broadcast %cst_52 : f32 to vector<16x128xf32>
    %63 = arith.maximumf %61, %62 : vector<16x128xf32>
    %c0_53 = arith.constant 0 : index
    %c0_54 = arith.constant 0 : index
    %64 = vector.load %arg6[%c0_53, %c0_54] : memref<128x128xf32, #tpu.memory_space<vmem>>, vector<128x128xf32>
    %cst_55 = arith.constant dense<0.000000e+00> : vector<16x128xf32>
    %65 = tpu.matmul %63, %64, %cst_55 {dimension_numbers = #tpu.dot_dimension_numbers<[1], [0], [0], [1], [0, 0, 1, 1], [], []>} : vector<16x128xf32>, vector<128x128xf32>, vector<16x128xf32> -> vector<16x128xf32>
    %c0_56 = arith.constant 0 : index
    %c0_57 = arith.constant 0 : index
    %66 = vector.load %arg7[%c0_56, %c0_57] : memref<1x128xf32, #tpu.memory_space<vmem>>, vector<1x128xf32>
    %67 = vector.broadcast %66 : vector<1x128xf32> to vector<16x128xf32>
    %68 = arith.addf %65, %67 : vector<16x128xf32>
    %cst_58 = arith.constant 0.000000e+00 : f32
    %69 = vector.broadcast %cst_58 : f32 to vector<16x128xf32>
    %70 = arith.maximumf %68, %69 : vector<16x128xf32>
    %c0_59 = arith.constant 0 : index
    %c0_60 = arith.constant 0 : index
    %71 = vector.load %arg8[%c0_59, %c0_60] : memref<1x128xf32, #tpu.memory_space<vmem>>, vector<1x128xf32>
    %72 = vector.broadcast %71 : vector<1x128xf32> to vector<16x128xf32>
    %73 = arith.mulf %70, %72 : vector<16x128xf32>
    %cst_61 = arith.constant dense<0.000000e+00> : vector<16xf32>
    %74 = vector.multi_reduction <add>, %73, %cst_61 [1] : vector<16x128xf32> to vector<16xf32>
    %75 = vector.shape_cast %74 : vector<16xf32> to vector<16x1xf32>
    %c0_62 = arith.constant 0 : index
    %c0_63 = arith.constant 0 : index
    %76 = vector.load %arg9[%c0_62, %c0_63] : memref<1x1xf32, #tpu.memory_space<vmem>>, vector<1x1xf32>
    %77 = vector.broadcast %76 : vector<1x1xf32> to vector<16x1xf32>
    %78 = arith.addf %75, %77 : vector<16x1xf32>
    %cst_64 = arith.constant 0.000000e+00 : f32
    %79 = vector.broadcast %cst_64 : f32 to vector<16x1xf32>
    %80 = arith.maximumf %78, %79 : vector<16x1xf32>
    %c0_65 = arith.constant 0 : index
    %c0_66 = arith.constant 0 : index
    %81 = vector.load %arg10[%c0_65, %c0_66] : memref<16x1xf32, #tpu.memory_space<vmem>>, vector<16x1xf32>
    tpu.vector_store %arg10[%c0_65, %c0_66], %80 {strides = array<i32>} : memref<16x1xf32, #tpu.memory_space<vmem>>, vector<16x1xf32>,
    return
  }
}

</mosaic_0001>

<bundles_post_ra>
// kernel: dbht_forward.1
= control target key start
LH: loop header
LB: loop body
LE: loop exit
PB: predicated region body
PF: predicated region fallthrough
CT: control target
= control target key end

     0   :  { %s2040_s0 = inlined_call_operand.hbm [shape: f32[16,13], index: 0, kind: input, shape index: {}]   ;;  %s2041_s1 = inlined_call_operand.hbm [shape: f32[13,60], index: 1, kind: input, shape index: {}]   ;;  %s2042_s2 = inlined_call_operand.hbm [shape: f32[60,60], index: 2, kind: input, shape index: {}]   ;;  %s2043_s3 = inlined_call_operand.vmem [shape: f32[1,60], index: 3, kind: input, shape index: {}]   ;;  %s2044_s4 = inlined_call_operand.hbm [shape: f32[60,128], index: 4, kind: input, shape index: {}]   ;;  %s2045_s5 = inlined_call_operand.vmem [shape: f32[1,128], index: 5, kind: input, shape index: {}]   ;;  %s2046_s6 = inlined_call_operand.hbm [shape: f32[128,128], index: 6, kind: input, shape index: {}]   ;;  %s2047_s7 = inlined_call_operand.vmem [shape: f32[1,128], index: 7, kind: input, shape index: {}]   ;;  %s2048_s8 = inlined_call_operand.vmem [shape: f32[1,128], index: 8, kind: input, shape index: {}]   ;;  %s2049_s9 = inlined_call_operand.<no memory space> [shape: f32[1,1], index: 9, kind: input, shape index: {}]   ;;  %s2050_s10 = inlined_call_operand.vmem [shape: f32[16,1], index: 10, kind: output, shape index: {}]  }
   0x1   :  { %v15_v0 = vstv %s2049_s9 }
   0x2   :  { %16 = vst [vmem:[#allocation4] sm:$0x1] %v15_v0 }
   0x3   :  { %17 = vsyncpa [#allocation6], 0 }
   0x4   :  { %18 = vsyncpa [#allocation8], 0 }
   0x5   :  { %19 = vsyncpa [#allocation11], 0  ;;  %s1725_s15 = smov [#allocation7]   ;;  %s1726_s17 = smov [#allocation10]  }
   0x6   :  { %s37_s16 = sshll.u32 %s1725_s15, 4  ;;  %s63_s18 = sshll.u32 %s1726_s17, 4  ;;  %s38_s16 = int_to_ptr.vmem [resolvable:$true] %s37_s16  ;;  %s1794_s18 = int_to_ptr.vmem [resolvable:$true] %s63_s18 }
   0x7   :  { %s1609_s21 = scalar_lea.hbm %s2041_s1, 256 }
   0x8   :  { %p1610_p0 = scmp.ne.s32.totalorder %s2041_s1, %s1609_s21  ;;  %p1613_p1 = scmp.lt.u32.totalorder %s1609_s21, %s2041_s1 }
   0xa   :  { %p1615_p2 = pnand %p1613_p1, %p1610_p0 }
   0xc   :  { %1618 = shalt.err (!%p1615_p2)
}
   0xd   :  { %s1619_s25 = scalar_lea.vmem %s38_s16, 256  ;;  %p1624_p4 = scmp.lt.s32.totalorder %s38_s16, %s38_s16 }
   0xe   :  { %p1620_p3 = scmp.ne.s32.totalorder %s38_s16, %s1619_s25  ;;  %p1625_p5 = scmp.lt.s32.totalorder %s1619_s25, %s1619_s25 }
  0x10   :  { %p1626_p6 = por %p1625_p5, %p1624_p4 }
  0x12   :  { %p1627_p7 = pnand %p1626_p6, %p1620_p3 }
  0x14   :  { %1630 = shalt.err (!%p1627_p7)
}
  0x15   :  { %s1727_s26 = smov 128   ;;  %s1728_s27 = smov 8  }
  0x16   :  { %43 = dma.hbm_to_vmem [thread:$0]  %s2041_s1, 256, %s38_s16, [#allocation8], %s1727_s26, %s1727_s26, %s1728_s27  }
  0x17   :  { %s1631_s12 = scalar_lea.hbm %s2044_s4, 1024 }
  0x18   :  { %p1632_p8 = scmp.ne.s32.totalorder %s2044_s4, %s1631_s12  ;;  %p1635_p9 = scmp.lt.u32.totalorder %s1631_s12, %s2044_s4 }
  0x1a   :  { %p1637_p10 = pnand %p1635_p9, %p1632_p8 }
  0x1c   :  { %1640 = shalt.err (!%p1637_p10)
}
  0x1d   :  { %s1641_s19 = scalar_lea.vmem %s1794_s18, 1024  ;;  %p1646_p12 = scmp.lt.s32.totalorder %s1794_s18, %s1794_s18 }
  0x1e   :  { %p1642_p11 = scmp.ne.s32.totalorder %s1794_s18, %s1641_s19  ;;  %p1647_p13 = scmp.lt.s32.totalorder %s1641_s19, %s1641_s19 }
  0x20   :  { %p1648_p0 = por %p1647_p13, %p1646_p12 }
  0x22   :  { %p1649_p1 = pnand %p1648_p0, %p1642_p11 }
  0x24   :  { %1652 = shalt.err (!%p1649_p1)
}
  0x25   :  { %69 = dma.hbm_to_vmem [thread:$0]  %s2044_s4, 1024, %s1794_s18, [#allocation11], %s1727_s26, %s1727_s26, %s1728_s27  }
  0x26   :  { %s1729_s20 = smov [#allocation5]   ;;  %s1730_s22 = smov [#allocation9]  }
  0x27   :  { %s25_s21 = sshll.u32 %s1729_s20, 4  ;;  %s49_s23 = sshll.u32 %s1730_s22, 4  ;;  %s26_s21 = int_to_ptr.vmem [resolvable:$true] %s25_s21  ;;  %s1831_s23 = int_to_ptr.vmem [resolvable:$true] %s49_s23 }
  0x28   :  { %s1653_s25 = scalar_lea.hbm %s2040_s0, 256 }
  0x29   :  { %p1654_p2 = scmp.ne.s32.totalorder %s2040_s0, %s1653_s25  ;;  %p1657_p3 = scmp.lt.u32.totalorder %s1653_s25, %s2040_s0 }
  0x2b   :  { %p1659_p4 = pnand %p1657_p3, %p1654_p2 }
  0x2d   :  { %1662 = shalt.err (!%p1659_p4)
}
  0x2e   :  { %s1663_s4 = scalar_lea.vmem %s26_s21, 256  ;;  %p1668_p6 = scmp.lt.s32.totalorder %s26_s21, %s26_s21 }
  0x2f   :  { %p1664_p5 = scmp.ne.s32.totalorder %s26_s21, %s1663_s4  ;;  %p1669_p7 = scmp.lt.s32.totalorder %s1663_s4, %s1663_s4 }
  0x31   :  { %p1670_p8 = por %p1669_p7, %p1668_p6 }
  0x33   :  { %p1671_p9 = pnand %p1670_p8, %p1664_p5 }
  0x35   :  { %1674 = shalt.err (!%p1671_p9)
}
  0x36   :  { %31 = dma.hbm_to_vmem [thread:$0]  %s2040_s0, 256, %s26_s21, [#allocation6], %s1727_s26, %s1727_s26, %s1728_s27  }
  0x37   :  { %s1675_s15 = scalar_lea.hbm %s2042_s2, 1024 }
  0x38   :  { %p1676_p10 = scmp.ne.s32.totalorder %s2042_s2, %s1675_s15  ;;  %p1679_p11 = scmp.lt.u32.totalorder %s1675_s15, %s2042_s2 }
  0x3a   :  { %p1681_p12 = pnand %p1679_p11, %p1676_p10 }
  0x3c   :  { %1684 = shalt.err (!%p1681_p12)
}
  0x3d   :  { %s1685_s20 = scalar_lea.vmem %s1831_s23, 1024  ;;  %p1690_p0 = scmp.lt.s32.totalorder %s1831_s23, %s1831_s23 }
  0x3e   :  { %p1686_p13 = scmp.ne.s32.totalorder %s1831_s23, %s1685_s20  ;;  %p1691_p1 = scmp.lt.s32.totalorder %s1685_s20, %s1685_s20 }
  0x40   :  { %p1692_p2 = por %p1691_p1, %p1690_p0 }
  0x42   :  { %p1693_p3 = pnand %p1692_p2, %p1686_p13 }
  0x44   :  { %1696 = shalt.err (!%p1693_p3)
}
  0x45   :  { %55 = dma.hbm_to_vmem [thread:$0]  %s2042_s2, 1024, %s1831_s23, [#allocation8], %s1727_s26, %s1727_s26, %s1728_s27  }
  0x46   :  { %s1731_s22 = smov [#allocation12]   ;;  %s1697_s28 = scalar_lea.hbm %s2046_s6, 2048 }
  0x47   :  { %s77_s9 = sshll.u32 %s1731_s22, 4  ;;  %p1698_p4 = scmp.ne.s32.totalorder %s2046_s6, %s1697_s28  ;;  %s78_s9 = int_to_ptr.vmem [resolvable:$true] %s77_s9 }
  0x48   :  { %p1701_p5 = scmp.lt.u32.totalorder %s1697_s28, %s2046_s6 }
  0x4a   :  { %p1703_p6 = pnand %p1701_p5, %p1698_p4 }
  0x4c   :  { %1706 = shalt.err (!%p1703_p6)
}
  0x4d   :  { %s1707_s18 = scalar_lea.vmem %s78_s9, 2048  ;;  %p1712_p8 = scmp.lt.s32.totalorder %s78_s9, %s78_s9 }
  0x4e   :  { %p1708_p7 = scmp.ne.s32.totalorder %s78_s9, %s1707_s18  ;;  %p1713_p9 = scmp.lt.s32.totalorder %s1707_s18, %s1707_s18 }
  0x50   :  { %p1714_p10 = por %p1713_p9, %p1712_p8 }
  0x52   :  { %p1715_p11 = pnand %p1714_p10, %p1708_p7 }
  0x54   :  { %1718 = shalt.err (!%p1715_p11)
}
  0x55   :  { %83 = dma.hbm_to_vmem [thread:$0]  %s2046_s6, 2048, %s78_s9, [#allocation11], %s1727_s26, %s1727_s26, %s1728_s27  }
  0x56   :  { %1719 = dma.done.wait [#allocation6], 256  }
  0x57   :  { %1720 = vsyncadd [#allocation6], 4294967040 }
  0x58   :  { %1721 = dma.done.wait [#allocation8], 1280  }
  0x59   :  { %1722 = vsyncadd [#allocation8], 4294966016 }
  0x5a   :  { %1723 = dma.done.wait [#allocation11], 3072  }
  0x5b   :  { %1724 = vsyncadd [#allocation11], 4294964224  ;;  %vm123_vm0 = vcmask 1044480   ;;  %vm116_vm1 = vcmask 105472   ;;  %vm1732_vm2 = vmmov 1   ;;  %v107_v1 = vld [vmem:[#allocation7] sm:$0xff]  ;;  %v213_v27 = vlaneseq }
  0x5c   :  { %vm1421_vm3 = vmpackc.low %vm123_vm0, %vm1732_vm2  ;;  %v108_v2 = vld [vmem:[#allocation7 + $0x8] sm:$0x1f]  ;;  %v105_v3 = vld [vmem:[#allocation5] sm:$0xff]  ;;  %v1733_v9 = vmov 0.0|0.0   ;;  %vm1734_vm4 = vmmov 0   ;;  %v1735_v12 = vmov 0.0  }
  0x5d   :  { %v1420_v4 = vpack.c.bf16 %v108_v2, %v107_v1  ;;  %1211 = vmatprep.mubr.msk.f32.mxu1 %vm116_vm1, %v105_v3  ;;  %v106_v5 = vld [vmem:[#allocation5 + $0x8] sm:$0xff]  ;;  %v205_v6 = vld [vmem:[#allocation9] sm:$0xff]  ;;  %v207_v8 = vld [vmem:[#allocation9 + $0x10] sm:$0xff]  ;;  %1439 = vmatprep.subr.bf16.mxu0 %v1733_v9  ;;  %vm223_vm5 = vcmask 1043456   ;;  %vm202_vm7 = vcmask 490496   ;;  %v214_v28 = vand.u32 127, %v213_v27 }
  0x5e   :  { %v206_v7 = vld [vmem:[#allocation9 + $0x8] sm:$0xff]  ;;  %v208_v11 = vld [vmem:[#allocation9 + $0x18] sm:$0xff]  ;;  %1249 = vmatprep.mubr.msk.f32.mxu0 %vm1734_vm4, %v1735_v12  ;;  %v209_v14 = vld [vmem:[#allocation9 + $0x20] sm:$0xff]  ;;  %vm298_vm9 = vcmask 484352   ;;  %vm1065_vm10 = vcmask 7168  }
  0x5f   :  { %1422 = vmatprep.subr.msk.bf16.mxu1 %vm1421_vm3, %v1420_v4  ;;  %v1885_v10 = vpack.c.bf16 %v206_v7, %v205_v6  ;;  %v1893_v13 = vpack.c.bf16 %v208_v11, %v207_v8  ;;  %v210_v15 = vld [vmem:[#allocation9 + $0x28] sm:$0xff]  ;;  %v211_v17 = vld [vmem:[#allocation9 + $0x30] sm:$0xff]  ;;  %v212_v18 = vld [vmem:[#allocation9 + $0x38] sm:$0xf]  ;;  %vm215_vm8 = vcmp.lt.s32.totalorder %v214_v28, 30 }
  0x60   :  { %1425 = vmatpush3.bf16.msk.msra.mxu1 %vm1421_vm3, %v1420_v4  ;;  %v1899_v16 = vpack.c.bf16 %v210_v15, %v209_v14  ;;  %v1905_v19 = vpack.c.bf16 %v212_v18, %v211_v17  ;;  %vm1909_vm6 = vmpackc.low %vm223_vm5, %vm1732_vm2  ;;  %v1926_v21 = vld [vmem:[%s2043_s3] ss:$0 sm:$0xff]  ;;  %v840_v3 = vld [vmem:[#allocation10] sm:$0xff] }
  0x61   :  { %1426 = vmatprep.subr.bf16.mxu1 %v1733_v9  ;;  %1441 = vmatpush3.bf16.msra.mxu0 %v1885_v10  ;;  %v841_v4 = vld [vmem:[#allocation10 + $0x8] sm:$0xff]  ;;  %v842_v6 = vld [vmem:[#allocation10 + $0x10] sm:$0xff]  ;;  %v843_v7 = vld [vmem:[#allocation10 + $0x18] sm:$0xff] }
  0x62   :  { %1442 = vmatprep.subr.bf16.mxu0 %v1733_v9  ;;  %v1534_v8 = vpack.c.bf16 %v843_v7, %v842_v6  ;;  %v941_v15 = vld [vmem:[#allocation12] sm:$0xff]  ;;  %v943_v17 = vld [vmem:[#allocation12 + $0x10] sm:$0xff]  ;;  %v948_v27 = vld [vmem:[#allocation12 + $0x38] sm:$0xff] }
  0x63   :  { %1212 = vmatmul.mubr.msk.f32.vlgmr.msra.gmra.mrb[0].mxu1 %vm116_vm1, %v106_v5  ;;  %v1530_v5 = vpack.c.bf16 %v841_v4, %v840_v3  ;;  %v950_v20 = vld [vmem:[#allocation12 + $0x48] sm:$0xff] }
  0x64   :  { %1230 = vmatprep.mubr.msk.f32.mxu1 %vm1734_vm4, %v1735_v12  ;;  %1428 = vmatpush3.bf16.msra.mxu1 %v1885_v10 }
  0x65   :  { %1429 = vmatprep.subr.bf16.mxu1 %v1733_v9  ;;  %1444 = vmatpush3.bf16.msra.mxu0 %v1893_v13 }
  0x66   :  { %1445 = vmatprep.subr.bf16.mxu0 %v1733_v9 }
  0x68   :  { %1431 = vmatpush3.bf16.msra.mxu1 %v1893_v13 }
  0x69   :  { %1432 = vmatprep.subr.bf16.mxu1 %v1733_v9  ;;  %1447 = vmatpush3.bf16.msra.mxu0 %v1899_v16 }
  0x6a   :  { %1448 = vmatprep.subr.bf16.mxu0 %v1733_v9 }
  0x6c   :  { %1434 = vmatpush3.bf16.msra.mxu1 %v1899_v16 }
  0x6d   :  { %1435 = vmatprep.subr.bf16.mxu1 %v1733_v9  ;;  %1451 = vmatpush3.bf16.msk.msra.mxu0 %vm1909_vm6, %v1905_v19 }
  0x6e   :  { %1465 = vmatprep.subr.bf16.mxu0 %v1733_v9 }
  0x70   :  { %1438 = vmatpush3.bf16.msk.msra.mxu1 %vm1909_vm6, %v1905_v19 }
  0x71   :  { %1452 = vmatprep.subr.bf16.mxu1 %v1733_v9 }
 0x136   :  { %v1213_v22 = vpop.f32.mrb[0].mxu1 }
 0x137   :  { %v199_v23 = vadd.f32 %v1213_v22, %v1926_v21  ;;  %v193_v24 = vpop.f32.mrb[1].mxu1 }
 0x138   :  { %v194_v25 = vadd.f32 %v1926_v21, %v193_v24  ;;  %v946_v24 = vld [vmem:[#allocation12 + $0x28] sm:$0xff] }
 0x139   :  { %204 = vst.msk [vmem:[#allocation2 + $0x8] sm:$0xff] %vm202_vm7, %v199_v23  ;;  %v945_v23 = vld [vmem:[#allocation12 + $0x20] sm:$0xff] }
 0x13a   :  { %203 = vst.msk [vmem:[#allocation2] sm:$0xff] %vm202_vm7, %v194_v25  ;;  %v1556_v25 = vpack.c.bf16 %v946_v24, %v945_v23 }
 0x140   :  { %v452_v46 = vld [vmem:[#allocation2 + $0x8] sm:$0x3]  ;;  %v528_v51 = vld [vmem:[#allocation2 + $0xa] sm:$0x3]  ;;  %v604_v56 = vld [vmem:[#allocation2 + $0xc] sm:$0x3] }
 0x141   :  { %v216_v26 = vld [vmem:[#allocation2] sm:$0x3]  ;;  %v219_v31 = vld [vmem:[#allocation2 + $0x2] sm:$0x3]  ;;  %v300_v36 = vld [vmem:[#allocation2 + $0x4] sm:$0x3] }
 0x142   :  { %1591 = vtanh.f32 %v216_v26  ;;  %v376_v41 = vld [vmem:[#allocation2 + $0x6] sm:$0x3]  ;;  %v680_v62 = vld [vmem:[#allocation2 + $0xe] sm:$0x3]  ;;  %v947_v26 = vld [vmem:[#allocation12 + $0x30] sm:$0xff] }
 0x143   :  { %v1560_v28 = vpack.c.bf16 %v948_v27, %v947_v26 }
 0x14c   :  { %v1592_v29 = vpop.eup %1591 }
 0x14d   :  { %v218_v30 = vsel %vm215_vm8, %v1592_v29, 0.0  ;;  %v949_v29 = vld [vmem:[#allocation12 + $0x40] sm:$0xff] }
 0x14e   :  { %1231 = vmatmul.mubr.msk.f32.vlgmr.msra.gmra.mrb[2].mxu1 %vm202_vm7, %v218_v30  ;;  %v1564_v30 = vpack.c.bf16 %v950_v20, %v949_v29 }
 0x14f   :  { %1454 = vmatpush3.bf16.msra.mxu1 %v1885_v10  ;;  %1268 = vmatprep.mubr.msk.f32.mxu1 %vm1734_vm4, %v1735_v12 }
 0x150   :  { %1455 = vmatprep.subr.bf16.mxu1 %v1733_v9 }
 0x153   :  { %1457 = vmatpush3.bf16.msra.mxu1 %v1893_v13 }
 0x154   :  { %1458 = vmatprep.subr.bf16.mxu1 %v1733_v9 }
 0x157   :  { %1460 = vmatpush3.bf16.msra.mxu1 %v1899_v16 }
 0x158   :  { %1461 = vmatprep.subr.bf16.mxu1 %v1733_v9 }
 0x15b   :  { %1464 = vmatpush3.bf16.msk.msra.mxu1 %vm1909_vm6, %v1905_v19 }
 0x15c   :  { %1478 = vmatprep.subr.bf16.mxu1 %v1733_v9 }
 0x221   :  { %v293_v32 = vpop.f32.mrb[2].mxu1 }
 0x222   :  { %v294_v33 = vadd.f32 %v293_v32, %v219_v31  ;;  %v1232_v34 = vpop.f32.mrb[3].mxu1  ;;  %v951_v31 = vld [vmem:[#allocation12 + $0x50] sm:$0xff]  ;;  %v952_v32 = vld [vmem:[#allocation12 + $0x58] sm:$0xff] }
 0x223   :  { %v953_v34 = vld [vmem:[#allocation12 + $0x60] sm:$0xff] }
 0x224   :  { %1593 = vtanh.f32 %v294_v33  ;;  %v1568_v33 = vpack.c.bf16 %v952_v32, %v951_v31 }
 0x22e   :  { %v1594_v35 = vpop.eup %1593 }
 0x22f   :  { %299 = vst.msk [vmem:[#allocation3] sm:$0x3] %vm298_vm9, %v1594_v35  ;;  %1250 = vmatmul.mubr.msk.f32.vlgmr.msra.gmra.mrb[0].mxu0 %vm202_vm7, %v1594_v35  ;;  %v954_v35 = vld [vmem:[#allocation12 + $0x68] sm:$0xff] }
 0x230   :  { %1467 = vmatpush3.bf16.msra.mxu0 %v1885_v10  ;;  %1287 = vmatprep.mubr.msk.f32.mxu0 %vm1734_vm4, %v1735_v12 }
 0x231   :  { %1468 = vmatprep.subr.bf16.mxu0 %v1733_v9 }
 0x234   :  { %1470 = vmatpush3.bf16.msra.mxu0 %v1893_v13 }
 0x235   :  { %1471 = vmatprep.subr.bf16.mxu0 %v1733_v9 }
 0x238   :  { %1473 = vmatpush3.bf16.msra.mxu0 %v1899_v16 }
 0x239   :  { %1474 = vmatprep.subr.bf16.mxu0 %v1733_v9 }
 0x23c   :  { %1477 = vmatpush3.bf16.msk.msra.mxu0 %vm1909_vm6, %v1905_v19 }
 0x23d   :  { %1491 = vmatprep.subr.bf16.mxu0 %v1733_v9 }
 0x302   :  { %v370_v37 = vpop.f32.mrb[0].mxu0 }
 0x303   :  { %v371_v38 = vadd.f32 %v370_v37, %v300_v36  ;;  %v1251_v39 = vpop.f32.mrb[1].mxu0  ;;  %v1572_v36 = vpack.c.bf16 %v954_v35, %v953_v34 }
 0x305   :  { %1595 = vtanh.f32 %v371_v38 }
 0x30f   :  { %v1596_v40 = vpop.eup %1595 }
 0x310   :  { %375 = vst.msk [vmem:[#allocation3 + $0x2] sm:$0x3] %vm298_vm9, %v1596_v40  ;;  %1269 = vmatmul.mubr.msk.f32.vlgmr.msra.gmra.mrb[4].mxu1 %vm202_vm7, %v1596_v40 }
 0x311   :  { %1480 = vmatpush3.bf16.msra.mxu1 %v1885_v10  ;;  %1306 = vmatprep.mubr.msk.f32.mxu1 %vm1734_vm4, %v1735_v12 }
 0x312   :  { %1481 = vmatprep.subr.bf16.mxu1 %v1733_v9 }
 0x315   :  { %1483 = vmatpush3.bf16.msra.mxu1 %v1893_v13 }
 0x316   :  { %1484 = vmatprep.subr.bf16.mxu1 %v1733_v9 }
 0x319   :  { %1486 = vmatpush3.bf16.msra.mxu1 %v1899_v16 }
 0x31a   :  { %1487 = vmatprep.subr.bf16.mxu1 %v1733_v9 }
 0x31d   :  { %1490 = vmatpush3.bf16.msk.msra.mxu1 %vm1909_vm6, %v1905_v19 }
 0x31e   :  { %1504 = vmatprep.subr.bf16.mxu1 %v1733_v9 }
 0x3e3   :  { %v446_v42 = vpop.f32.mrb[4].mxu1 }
 0x3e4   :  { %v447_v43 = vadd.f32 %v446_v42, %v376_v41  ;;  %v1270_v44 = vpop.f32.mrb[5].mxu1  ;;  %v955_v42 = vld [vmem:[#allocation12 + $0x70] sm:$0xff] }
 0x3e6   :  { %1597 = vtanh.f32 %v447_v43  ;;  %v956_v43 = vld [vmem:[#allocation12 + $0x78] sm:$0xff] }
 0x3e7   :  { %v1576_v44 = vpack.c.bf16 %v956_v43, %v955_v42 }
 0x3f0   :  { %v1598_v45 = vpop.eup %1597 }
 0x3f1   :  { %451 = vst.msk [vmem:[#allocation3 + $0x4] sm:$0x3] %vm298_vm9, %v1598_v45  ;;  %1288 = vmatmul.mubr.msk.f32.vlgmr.msra.gmra.mrb[2].mxu0 %vm202_vm7, %v1598_v45  ;;  %v1096_v45 = vld [vmem:[%s2045_s5] ss:$0 sm:$0xff] }
 0x3f2   :  { %1493 = vmatpush3.bf16.msra.mxu0 %v1885_v10  ;;  %1325 = vmatprep.mubr.msk.f32.mxu0 %vm1734_vm4, %v1735_v12 }
 0x3f3   :  { %1494 = vmatprep.subr.bf16.mxu0 %v1733_v9 }
 0x3f6   :  { %1496 = vmatpush3.bf16.msra.mxu0 %v1893_v13 }
 0x3f7   :  { %1497 = vmatprep.subr.bf16.mxu0 %v1733_v9 }
 0x3fa   :  { %1499 = vmatpush3.bf16.msra.mxu0 %v1899_v16 }
 0x3fb   :  { %1500 = vmatprep.subr.bf16.mxu0 %v1733_v9 }
 0x3fe   :  { %1503 = vmatpush3.bf16.msk.msra.mxu0 %vm1909_vm6, %v1905_v19 }
 0x3ff   :  { %1517 = vmatprep.subr.bf16.mxu0 %v1733_v9 }
 0x4c4   :  { %v522_v47 = vpop.f32.mrb[2].mxu0 }
 0x4c5   :  { %v523_v48 = vadd.f32 %v522_v47, %v452_v46  ;;  %v1289_v49 = vpop.f32.mrb[3].mxu0 }
 0x4c7   :  { %1599 = vtanh.f32 %v523_v48 }
 0x4d1   :  { %v1600_v50 = vpop.eup %1599 }
 0x4d2   :  { %527 = vst.msk [vmem:[#allocation3 + $0x6] sm:$0x3] %vm298_vm9, %v1600_v50  ;;  %1307 = vmatmul.mubr.msk.f32.vlgmr.msra.gmra.mrb[6].mxu1 %vm202_vm7, %v1600_v50 }
 0x4d3   :  { %1506 = vmatpush3.bf16.msra.mxu1 %v1885_v10  ;;  %1344 = vmatprep.mubr.msk.f32.mxu1 %vm1734_vm4, %v1735_v12 }
 0x4d4   :  { %1507 = vmatprep.subr.bf16.mxu1 %v1733_v9 }
 0x4d7   :  { %1509 = vmatpush3.bf16.msra.mxu1 %v1893_v13 }
 0x4d8   :  { %1510 = vmatprep.subr.bf16.mxu1 %v1733_v9 }
 0x4d9   :  { %v838_v61 = vld [vmem:[#allocation3] sm:$0xff] }
 0x4db   :  { %1512 = vmatpush3.bf16.msra.mxu1 %v1899_v16 }
 0x4dc   :  { %1513 = vmatprep.subr.bf16.mxu1 %v1733_v9 }
 0x4df   :  { %1516 = vmatpush3.bf16.msk.msra.mxu1 %vm1909_vm6, %v1905_v19 }
 0x4e0   :  { %1531 = vmatprep.subr.bf16.mxu1 %v1530_v5 }
 0x5a5   :  { %v598_v52 = vpop.f32.mrb[6].mxu1 }
 0x5a6   :  { %v599_v53 = vadd.f32 %v598_v52, %v528_v51  ;;  %v1308_v54 = vpop.f32.mrb[7].mxu1  ;;  %v1100_v51 = vld [vmem:[%s2047_s7] ss:$0 sm:$0xff] }
 0x5a8   :  { %1601 = vtanh.f32 %v599_v53 }
 0x5b2   :  { %v1602_v55 = vpop.eup %1601 }
 0x5b3   :  { %603 = vst.msk [vmem:[#allocation3 + $0x8] sm:$0x3] %vm298_vm9, %v1602_v55  ;;  %1326 = vmatmul.mubr.msk.f32.vlgmr.msra.gmra.mrb[4].mxu0 %vm202_vm7, %v1602_v55 }
 0x5b4   :  { %1519 = vmatpush3.bf16.msra.mxu0 %v1885_v10  ;;  %1363 = vmatprep.mubr.msk.f32.mxu0 %vm1734_vm4, %v1735_v12  ;;  %v845_v10 = vld [vmem:[#allocation10 + $0x28] sm:$0xff]  ;;  %v846_v12 = vld [vmem:[#allocation10 + $0x30] sm:$0xff] }
 0x5b5   :  { %1520 = vmatprep.subr.bf16.mxu0 %v1733_v9 }
 0x5b8   :  { %1522 = vmatpush3.bf16.msra.mxu0 %v1893_v13  ;;  %v847_v13 = vld [vmem:[#allocation10 + $0x38] sm:$0xf] }
 0x5b9   :  { %1523 = vmatprep.subr.bf16.mxu0 %v1733_v9  ;;  %v1542_v14 = vpack.c.bf16 %v847_v13, %v846_v12 }
 0x5bc   :  { %1525 = vmatpush3.bf16.msra.mxu0 %v1899_v16  ;;  %v942_v16 = vld [vmem:[#allocation12 + $0x8] sm:$0xff] }
 0x5bd   :  { %1526 = vmatprep.subr.bf16.mxu0 %v1733_v9  ;;  %v844_v9 = vld [vmem:[#allocation10 + $0x20] sm:$0xff]  ;;  %v1548_v18 = vpack.c.bf16 %v942_v16, %v941_v15 }
 0x5be   :  { %v1538_v11 = vpack.c.bf16 %v845_v10, %v844_v9 }
 0x5c0   :  { %1529 = vmatpush3.bf16.msk.msra.mxu0 %vm1909_vm6, %v1905_v19  ;;  %v944_v19 = vld [vmem:[#allocation12 + $0x18] sm:$0xff] }
 0x5c1   :  { %v1552_v22 = vpack.c.bf16 %v944_v19, %v943_v17  ;;  %1549 = vmatprep.subr.bf16.mxu0 %v1548_v18 }
 0x686   :  { %v674_v57 = vpop.f32.mrb[4].mxu0 }
 0x687   :  { %v675_v58 = vadd.f32 %v674_v57, %v604_v56  ;;  %v1327_v59 = vpop.f32.mrb[5].mxu0  ;;  %v1101_v56 = vld [vmem:[%s2048_s8] ss:$0 sm:$0xff] }
 0x689   :  { %1603 = vtanh.f32 %v675_v58 }
 0x693   :  { %v1604_v60 = vpop.eup %1603 }
 0x694   :  { %679 = vst.msk [vmem:[#allocation3 + $0xa] sm:$0x3] %vm298_vm9, %v1604_v60  ;;  %1345 = vmatmul.mubr.msk.f32.vlgmr.msra.gmra.mrb[8].mxu1 %vm202_vm7, %v1604_v60 }
 0x695   :  { %1382 = vmatprep.mubr.msk.f32.mxu1 %vm202_vm7, %v838_v61  ;;  %1533 = vmatpush3.bf16.msra.mxu1 %v1530_v5  ;;  %v1102_v61 = vld [vmem:[#allocation4] ss:$0 sm:$0xff] }
 0x696   :  { %1535 = vmatprep.subr.bf16.mxu1 %v1534_v8 }
 0x699   :  { %1537 = vmatpush3.bf16.msra.mxu1 %v1534_v8 }
 0x69a   :  { %1539 = vmatprep.subr.bf16.mxu1 %v1538_v11 }
 0x69d   :  { %1541 = vmatpush3.bf16.msra.mxu1 %v1538_v11 }
 0x69e   :  { %1544 = vmatprep.subr.msk.bf16.mxu1 %vm1909_vm6, %v1542_v14 }
 0x6a1   :  { %1547 = vmatpush3.bf16.msk.msra.mxu1 %vm1909_vm6, %v1542_v14 }
 0x767   :  { %v750_v63 = vpop.f32.mrb[8].mxu1 }
 0x768   :  { %v751_v0 = vadd.f32 %v750_v63, %v680_v62  ;;  %v1346_v1 = vpop.f32.mrb[9].mxu1 }
 0x76a   :  { %1605 = vtanh.f32 %v751_v0 }
 0x774   :  { %v1606_v2 = vpop.eup %1605 }
 0x775   :  { %755 = vst.msk [vmem:[#allocation3 + $0xc] sm:$0x3] %vm298_vm9, %v1606_v2  ;;  %1364 = vmatmul.mubr.msk.f32.vlgmr.msra.gmra.mrb[6].mxu0 %vm202_vm7, %v1606_v2 }
 0x776   :  { %1551 = vmatpush3.bf16.msra.mxu0 %v1548_v18 }
 0x777   :  { %1553 = vmatprep.subr.bf16.mxu0 %v1552_v22 }
 0x77a   :  { %1555 = vmatpush3.bf16.msra.mxu0 %v1552_v22 }
 0x77b   :  { %1557 = vmatprep.subr.bf16.mxu0 %v1556_v25 }
 0x77e   :  { %1559 = vmatpush3.bf16.msra.mxu0 %v1556_v25 }
 0x77f   :  { %1561 = vmatprep.subr.bf16.mxu0 %v1560_v28 }
 0x782   :  { %1563 = vmatpush3.bf16.msra.mxu0 %v1560_v28 }
 0x783   :  { %1565 = vmatprep.subr.bf16.mxu0 %v1564_v30 }
 0x786   :  { %1567 = vmatpush3.bf16.msra.mxu0 %v1564_v30 }
 0x787   :  { %1569 = vmatprep.subr.bf16.mxu0 %v1568_v33 }
 0x78a   :  { %1571 = vmatpush3.bf16.msra.mxu0 %v1568_v33 }
 0x78b   :  { %1573 = vmatprep.subr.bf16.mxu0 %v1572_v36 }
 0x78e   :  { %1575 = vmatpush3.bf16.msra.mxu0 %v1572_v36 }
 0x78f   :  { %1577 = vmatprep.subr.bf16.mxu0 %v1576_v44 }
 0x792   :  { %1579 = vmatpush3.bf16.msra.mxu0 %v1576_v44 }
 0x848   :  { %v832_v37 = vpop.f32.mrb[6].mxu0 }
 0x849   :  { %v833_v38 = vadd.f32 %v1926_v21, %v832_v37  ;;  %v1365_v39 = vpop.f32.mrb[7].mxu0 }
 0x84b   :  { %1607 = vtanh.f32 %v833_v38 }
 0x855   :  { %v1608_v40 = vpop.eup %1607 }
 0x856   :  { %837 = vst.msk [vmem:[#allocation3 + $0xe] sm:$0x3] %vm298_vm9, %v1608_v40 }
 0x85d   :  { %v839_v41 = vld [vmem:[#allocation3 + $0x8] sm:$0xff] }
 0x85e   :  { %1383 = vmatmul.mubr.msk.f32.vlgmr.msra.gmra.mrb[10].mxu1 %vm202_vm7, %v839_v41 }
 0x931   :  { %v1384_v46 = vpop.f32.mrb[10].mxu1 }
 0x932   :  { %v936_v47 = vadd.f32 %v1384_v46, %v1096_v45  ;;  %v930_v21 = vpop.f32.mrb[11].mxu1 }
 0x933   :  { %v931_v48 = vadd.f32 %v1096_v45, %v930_v21 }
 0x934   :  { %v940_v50 = vmax.f32 %v936_v47, 0.0 }
 0x935   :  { %v939_v49 = vmax.f32 %v931_v48, 0.0 }
 0x937   :  { %1417 = vmatprep.mubr.f32.mxu0 %v939_v49 }
 0x938   :  { %1418 = vmatmul.mubr.f32.vlgmr.msra.gmra.mrb[8].mxu0 %v940_v50 }
 0xa0b   :  { %v1419_v52 = vpop.f32.mrb[8].mxu0 }
 0xa0c   :  { %v1030_v53 = vpop.f32.mrb[9].mxu0  ;;  %v1036_v54 = vadd.f32 %v1419_v52, %v1100_v51 }
 0xa0d   :  { %v1031_v55 = vadd.f32 %v1100_v51, %v1030_v53 }
 0xa0e   :  { %v1040_v58 = vmax.f32 %v1036_v54, 0.0 }
 0xa0f   :  { %v1039_v57 = vmax.f32 %v1031_v55, 0.0 }
 0xa10   :  { %v1049_v60 = vmul.f32 %v1101_v56, %v1040_v58 }
 0xa11   :  { %v1048_v59 = vmul.f32 %v1101_v56, %v1039_v57 }
 0xa13   :  { %1050 = vadd.xlane.f32.xlu0 %v1048_v59 }
 0xa17   :  { %1052 = vadd.xlane.f32.xlu0 %v1049_v60 }
 0xaa0   :  { %v1051_v62 = vpop.xlane.xlu0 %1050 }
 0xaa1   :  { %v1061_v63 = vadd.f32 %v1102_v61, %v1051_v62 }
 0xaa3   :  { %v1063_v0 = vmax.f32 %v1061_v63, 0.0 }
 0xaa4   :  { %v1053_v1 = vpop.xlane.xlu0 %1052 }
 0xaa5   :  { %1066 = vst.msk [vmem:[%s2050_s10] sm:$0xff] %vm1065_vm10, %v1063_v0  ;;  %v1062_v2 = vadd.f32 %v1102_v61, %v1053_v1 }
 0xaa7   :  { %v1064_v3 = vmax.f32 %v1062_v2, 0.0 }
 0xaa9   :  { %1067 = vst.msk [vmem:[%s2050_s10 + $0x8] sm:$0xff] %vm1065_vm10, %v1064_v3 }
 0xaaa   :  { %1072 = vsyncpa [#allocation6], 1 }
 0xaab   :  { %1073 = vsyncpa [#allocation8], 1 }
 0xaac   :  { %1074 = vsyncpa [#allocation11], 1 }

</bundles_post_ra>
